<compile_context>
chip_gen: v7x
topology: tpu7x:2x2x1
jax: 0.10.0
libtpu: 0.0.40
codegen_flags: <defaults>
</compile_context>

<pallas_src>
import functools

import jax
import jax.numpy as jnp
from jax.experimental import pallas as pl
from jax.experimental.pallas import tpu as pltpu


def _round_up(x, m):
    return (x + m - 1) // m * m


# ------------------------------ fused kernel ------------------------------ #

def _decoder_kernel(*refs, n_deconv):
    """refs = (z, wd, bd, w_0, b_0, ..., w_{n-1}, b_{n-1}, wf, bf, out)."""
    z_ref, wd_ref, bd_ref = refs[0], refs[1], refs[2]
    layer_refs = refs[3:3 + 2 * n_deconv]
    wf_ref, bf_ref, out_ref = refs[-3], refs[-2], refs[-1]

    # dense + ReLU (bf16 inputs, f32 accumulate)
    x = jnp.dot(z_ref[...], wd_ref[...], preferred_element_type=jnp.float32)
    x = jnp.maximum(x + bd_ref[...], 0.0)

    # every ConvTranspose1d == one matmul + bias + ReLU on the position-major
    # activation layout (the deconv stencil is unrolled into the weight).
    for j in range(n_deconv):
        w_ref = layer_refs[2 * j]
        b_ref = layer_refs[2 * j + 1]
        x = jnp.dot(x.astype(w_ref.dtype), w_ref[...],
                    preferred_element_type=jnp.float32)
        x = jnp.maximum(x + b_ref[...], 0.0)

    # final dense (channel-major NCL flatten already folded into wf's rows)
    y = jnp.dot(x.astype(wf_ref.dtype), wf_ref[...],
                preferred_element_type=jnp.float32)
    out_ref[...] = (y + bf_ref[...]).astype(out_ref.dtype)


# ------------------------- host-side weight folding ------------------------ #

def _deconv_to_matrix(w_iok, b, l_in):
    """Unroll ConvTranspose1d(kernel=3, stride=2, pad=1, out_pad=1) into a
    dense matrix acting on a position-major (pos*Cin + ci) row layout.

      out[2l]   = x[l]   @ W[:, :, 1]
      out[2l+1] = x[l]   @ W[:, :, 2] + x[l+1] @ W[:, :, 0]   (x[L] = 0)
    """
    cin, cout, _ = w_iok.shape
    l_out = 2 * l_in
    w4 = jnp.zeros((l_in, cin, l_out, cout), jnp.float32)
    for l in range(l_in):
        w4 = w4.at[l, :, 2 * l, :].set(w_iok[:, :, 1])
        w4 = w4.at[l, :, 2 * l + 1, :].set(w_iok[:, :, 2])
        if l > 0:
            w4 = w4.at[l, :, 2 * l - 1, :].set(w_iok[:, :, 0])
    return w4.reshape(l_in * cin, l_out * cout), jnp.tile(b, l_out)


def init_raw_params(key, seq_len, feat_dim, hidden_layer_sizes, latent_dim,
                    encoder_last_dense_dim):
    """PyTorch-layout parameters (what the nn.Module would hold)."""
    n_deconv = len(hidden_layer_sizes)
    keys = jax.random.split(key, 4 + 2 * n_deconv)
    p = {}
    p["dense_w"] = 0.1 * jax.random.normal(
        keys[0], (encoder_last_dense_dim, latent_dim), jnp.float32)
    p["dense_b"] = 0.1 * jax.random.normal(
        keys[1], (encoder_last_dense_dim,), jnp.float32)

    deconvs = []
    in_ch = hidden_layer_sizes[-1]
    out_chs = list(reversed(hidden_layer_sizes[:-1])) + [feat_dim]
    k = 2
    for oc in out_chs:
        w = 0.1 * jax.random.normal(keys[k], (in_ch, oc, 3), jnp.float32)
        b = 0.1 * jax.random.normal(keys[k + 1], (oc,), jnp.float32)
        deconvs.append((w, b))
        in_ch = oc
        k += 2
    p["deconvs"] = deconvs

    L = encoder_last_dense_dim // hidden_layer_sizes[-1]
    for _ in range(n_deconv):
        L = (L - 1) * 2 - 2 + 3 + 1
    p["L_final"] = L
    p["final_w"] = 0.1 * jax.random.normal(
        keys[k], (seq_len * feat_dim, feat_dim * L), jnp.float32)
    p["final_b"] = 0.1 * jax.random.normal(
        keys[k + 1], (seq_len * feat_dim,), jnp.float32)
    return p


def fold_params(raw, seq_len, feat_dim, hidden_layer_sizes,
                encoder_last_dense_dim, compute_dtype=jnp.bfloat16):
    """Precompute every transpose/unroll/permutation once (free at inference)."""
    p = {}
    p["dense_w_t"] = raw["dense_w"].T.astype(compute_dtype)          # (latent, E)
    p["dense_b"] = raw["dense_b"].reshape(1, -1).astype(jnp.float32)

    deconvs = []
    l_in = encoder_last_dense_dim // hidden_layer_sizes[-1]
    for (w, b) in raw["deconvs"]:
        wm, bm = _deconv_to_matrix(w, b, l_in)
        deconvs.append((wm.astype(compute_dtype),
                        bm.reshape(1, -1).astype(jnp.float32)))
        l_in *= 2
    p["deconvs"] = deconvs
    l_final = l_in

    out_dim = seq_len * feat_dim
    # PyTorch flatten(1) on NCL (B, feat, L_final): flat index = c*L_final + l.
    # Kernel activation layout: column index = l*feat + c.  Fold the
    # permutation + transpose into final_w once.
    wf = raw["final_w"].reshape(out_dim, feat_dim, l_final)          # [o, c, l]
    wf = jnp.transpose(wf, (2, 1, 0)).reshape(l_final * feat_dim, out_dim)
    p["final_w_t"] = wf.astype(compute_dtype)
    p["final_b"] = raw["final_b"].reshape(1, -1).astype(jnp.float32)
    return p


# ------------------------------- forward ----------------------------------- #

def conv_decoder_forward(params, z, seq_len, feat_dim):
    B, latent = z.shape
    out_dim = seq_len * feat_dim
    compute_dtype = params["dense_w_t"].dtype

    # batch tiling: sublane-aligned row tile; pad batch to a whole number of tiles
    TB = min(_round_up(B, 8), 512)
    Bp = _round_up(B, TB)
    zp = z.astype(compute_dtype)
    if Bp != B:
        zp = jnp.pad(zp, ((0, Bp - B), (0, 0)))

    weights = [params["dense_w_t"]]
    biases = [params["dense_b"]]
    for (w, b) in params["deconvs"]:
        weights.append(w)
        biases.append(b)
    weights.append(params["final_w_t"])
    biases.append(params["final_b"])
    n_deconv = len(params["deconvs"])

    # operands: z, then (weight, bias) per layer; weights use constant
    # index_maps so they stay VMEM-resident across batch-tile grid steps.
    operands = [zp]
    in_specs = [pl.BlockSpec((TB, latent), lambda i: (i, 0))]
    flops = 0
    bytes_accessed = zp.size * zp.dtype.itemsize + Bp * out_dim * 4
    resident_bytes = 0
    for w, b in zip(weights, biases):
        operands += [w, b]
        in_specs += [pl.BlockSpec(w.shape, lambda i: (0, 0)),
                     pl.BlockSpec(b.shape, lambda i: (0, 0))]
        flops += 2 * Bp * w.shape[0] * w.shape[1]
        wb = w.size * w.dtype.itemsize + b.size * b.dtype.itemsize
        bytes_accessed += wb
        resident_bytes += wb

    # explicit scoped-VMEM budget (defaults are 16/32 MiB; keep below v7x's
    # 64 MiB physical).  Includes double-buffered z/out tiles.
    resident_bytes += 2 * (TB * latent * zp.dtype.itemsize + TB * out_dim * 4)
    vmem_limit = int(min(max(4 * resident_bytes, 32 * 1024 * 1024),
                         60 * 1024 * 1024))

    out = pl.pallas_call(
        functools.partial(_decoder_kernel, n_deconv=n_deconv),
        out_shape=jax.ShapeDtypeStruct((Bp, out_dim), jnp.float32),
        grid=(Bp // TB,),
        in_specs=in_specs,
        out_specs=pl.BlockSpec((TB, out_dim), lambda i: (i, 0)),
        compiler_params=pltpu.CompilerParams(
            dimension_semantics=("parallel",),
            vmem_limit_bytes=vmem_limit),
        cost_estimate=pl.CostEstimate(
            flops=int(flops), transcendentals=0,
            bytes_accessed=int(bytes_accessed)),
    )(*operands)

    return out[:B].reshape(B, seq_len, feat_dim)


# -------------------------- pure-JAX f32 reference ------------------------- #

def _ref_conv_transpose1d(x_ncl, w, b):
    """PyTorch ConvTranspose1d(k=3, s=2, p=1, out_pad=1), NCL input, f32."""
    bsz, cin, l_in = x_ncl.shape
    cout = w.shape[1]
    l_out = 2 * l_in
    y = jnp.zeros((bsz, cout, l_out), jnp.float32) + b[None, :, None]
    for m in range(l_in):
        for k in range(3):
            o = 2 * m - 1 + k
            if 0 <= o < l_out:
                y = y.at[:, :, o].add(x_ncl[:, :, m] @ w[:, :, k])
    return y


def ref_forward(raw, z, seq_len, feat_dim, hidden_layer_sizes):
    bsz = z.shape[0]
    x = jax.nn.relu(z @ raw["dense_w"].T + raw["dense_b"])
    x = x.reshape(bsz, -1, hidden_layer_sizes[-1]).transpose(0, 2, 1)  # NCL
    for (w, b) in raw["deconvs"]:
        x = jax.nn.relu(_ref_conv_transpose1d(x, w, b))
    x = x.reshape(bsz, -1)                         # flatten(1) on (B, C, L)
    x = x @ raw["final_w"].T + raw["final_b"]
    return x.reshape(-1, seq_len, feat_dim)


if __name__ == "__main__":
    seq_len = 8
    feat_dim = 4
    hidden_layer_sizes = [16, 32]
    latent_dim = 8
    encoder_last_dense_dim = 64
    batch = 2

    key = jax.random.PRNGKey(0)
    kz, kp = jax.random.split(key)
    z = jax.random.normal(kz, (batch, latent_dim), jnp.float32)

    raw = init_raw_params(kp, seq_len, feat_dim, hidden_layer_sizes,
                          latent_dim, encoder_last_dense_dim)
    params = fold_params(raw, seq_len, feat_dim, hidden_layer_sizes,
                         encoder_last_dense_dim)

    out = conv_decoder_forward(params, z, seq_len, feat_dim)
    out = jax.block_until_ready(out)
    assert out.shape == (batch, seq_len, feat_dim), out.shape
    assert out.dtype == jnp.float32

    # correctness vs an f32 replica of the PyTorch module (kernel uses bf16
    # weights/activations with f32 accumulation -> loose tolerance).
    ref = jax.block_until_ready(
        ref_forward(raw, z, seq_len, feat_dim, hidden_layer_sizes))
    err = float(jnp.max(jnp.abs(out - ref)))
    assert err < 5e-2, f"max abs error vs reference: {err}"

    print("KERNEL_OK")
</pallas_src>

<mosaic_0001>
module attributes {stable_mosaic.version = 11 : i64} {
  func.func @_decoder_kernel(%arg0: i32, %arg1: memref<8x8xbf16, #tpu.memory_space<vmem>>, %arg2: memref<8x64xbf16, #tpu.memory_space<vmem>>, %arg3: memref<1x64xf32, #tpu.memory_space<vmem>>, %arg4: memref<64x64xbf16, #tpu.memory_space<vmem>>, %arg5: memref<1x64xf32, #tpu.memory_space<vmem>>, %arg6: memref<64x32xbf16, #tpu.memory_space<vmem>>, %arg7: memref<1x32xf32, #tpu.memory_space<vmem>>, %arg8: memref<32x32xbf16, #tpu.memory_space<vmem>>, %arg9: memref<1x32xf32, #tpu.memory_space<vmem>>, %arg10: memref<8x32xf32, #tpu.memory_space<vmem>>) attributes {dimension_semantics = [#tpu.dimension_semantics<parallel>], iteration_bounds = array<i64: 1>, scalar_prefetch = 0 : i64, scratch_operands = 0 : i64, tpu.core_type = #tpu.core_type<tc>, window_params = [{transform_indices = @transform_0, window_bounds = array<i64: 8, 8>}, {pipeline_mode = #tpu.pipeline_mode<synchronous>, transform_indices = @transform_1, window_bounds = array<i64: 8, 64>}, {pipeline_mode = #tpu.pipeline_mode<synchronous>, transform_indices = @transform_2, window_bounds = array<i64: 1, 64>}, {pipeline_mode = #tpu.pipeline_mode<synchronous>, transform_indices = @transform_3, window_bounds = array<i64: 64, 64>}, {pipeline_mode = #tpu.pipeline_mode<synchronous>, transform_indices = @transform_4, window_bounds = array<i64: 1, 64>}, {pipeline_mode = #tpu.pipeline_mode<synchronous>, transform_indices = @transform_5, window_bounds = array<i64: 64, 32>}, {pipeline_mode = #tpu.pipeline_mode<synchronous>, transform_indices = @transform_6, window_bounds = array<i64: 1, 32>}, {pipeline_mode = #tpu.pipeline_mode<synchronous>, transform_indices = @transform_7, window_bounds = array<i64: 32, 32>}, {pipeline_mode = #tpu.pipeline_mode<synchronous>, transform_indices = @transform_8, window_bounds = array<i64: 1, 32>}, {transform_indices = @transform_9, window_bounds = array<i64: 8, 32>}]} {
    %c0 = arith.constant 0 : index
    %c0_0 = arith.constant 0 : index
    %0 = vector.load %arg1[%c0, %c0_0] : memref<8x8xbf16, #tpu.memory_space<vmem>>, vector<8x8xbf16>
    %c0_1 = arith.constant 0 : index
    %c0_2 = arith.constant 0 : index
    %1 = vector.load %arg2[%c0_1, %c0_2] : memref<8x64xbf16, #tpu.memory_space<vmem>>, vector<8x64xbf16>
    %cst = arith.constant dense<0.000000e+00> : vector<8x64xf32>
    %2 = tpu.matmul %0, %1, %cst {dimension_numbers = #tpu.dot_dimension_numbers<[1], [0], [0], [1], [0, 0, 1, 1], [], []>} : vector<8x8xbf16>, vector<8x64xbf16>, vector<8x64xf32> -> vector<8x64xf32>
    %c0_3 = arith.constant 0 : index
    %c0_4 = arith.constant 0 : index
    %3 = vector.load %arg3[%c0_3, %c0_4] : memref<1x64xf32, #tpu.memory_space<vmem>>, vector<1x64xf32>
    %4 = vector.broadcast %3 : vector<1x64xf32> to vector<8x64xf32>
    %5 = arith.addf %2, %4 : vector<8x64xf32>
    %cst_5 = arith.constant 0.000000e+00 : f32
    %6 = vector.broadcast %cst_5 : f32 to vector<8x64xf32>
    %7 = arith.maximumf %5, %6 : vector<8x64xf32>
    %8 = arith.truncf %7 : vector<8x64xf32> to vector<8x64xbf16>
    %c0_6 = arith.constant 0 : index
    %c0_7 = arith.constant 0 : index
    %9 = vector.load %arg4[%c0_6, %c0_7] : memref<64x64xbf16, #tpu.memory_space<vmem>>, vector<64x64xbf16>
    %cst_8 = arith.constant dense<0.000000e+00> : vector<8x64xf32>
    %10 = tpu.matmul %8, %9, %cst_8 {dimension_numbers = #tpu.dot_dimension_numbers<[1], [0], [0], [1], [0, 0, 1, 1], [], []>} : vector<8x64xbf16>, vector<64x64xbf16>, vector<8x64xf32> -> vector<8x64xf32>
    %c0_9 = arith.constant 0 : index
    %c0_10 = arith.constant 0 : index
    %11 = vector.load %arg5[%c0_9, %c0_10] : memref<1x64xf32, #tpu.memory_space<vmem>>, vector<1x64xf32>
    %12 = vector.broadcast %11 : vector<1x64xf32> to vector<8x64xf32>
    %13 = arith.addf %10, %12 : vector<8x64xf32>
    %cst_11 = arith.constant 0.000000e+00 : f32
    %14 = vector.broadcast %cst_11 : f32 to vector<8x64xf32>
    %15 = arith.maximumf %13, %14 : vector<8x64xf32>
    %16 = arith.truncf %15 : vector<8x64xf32> to vector<8x64xbf16>
    %c0_12 = arith.constant 0 : index
    %c0_13 = arith.constant 0 : index
    %17 = vector.load %arg6[%c0_12, %c0_13] : memref<64x32xbf16, #tpu.memory_space<vmem>>, vector<64x32xbf16>
    %cst_14 = arith.constant dense<0.000000e+00> : vector<8x32xf32>
    %18 = tpu.matmul %16, %17, %cst_14 {dimension_numbers = #tpu.dot_dimension_numbers<[1], [0], [0], [1], [0, 0, 1, 1], [], []>} : vector<8x64xbf16>, vector<64x32xbf16>, vector<8x32xf32> -> vector<8x32xf32>
    %c0_15 = arith.constant 0 : index
    %c0_16 = arith.constant 0 : index
    %19 = vector.load %arg7[%c0_15, %c0_16] : memref<1x32xf32, #tpu.memory_space<vmem>>, vector<1x32xf32>
    %20 = vector.broadcast %19 : vector<1x32xf32> to vector<8x32xf32>
    %21 = arith.addf %18, %20 : vector<8x32xf32>
    %cst_17 = arith.constant 0.000000e+00 : f32
    %22 = vector.broadcast %cst_17 : f32 to vector<8x32xf32>
    %23 = arith.maximumf %21, %22 : vector<8x32xf32>
    %24 = arith.truncf %23 : vector<8x32xf32> to vector<8x32xbf16>
    %c0_18 = arith.constant 0 : index
    %c0_19 = arith.constant 0 : index
    %25 = vector.load %arg8[%c0_18, %c0_19] : memref<32x32xbf16, #tpu.memory_space<vmem>>, vector<32x32xbf16>
    %cst_20 = arith.constant dense<0.000000e+00> : vector<8x32xf32>
    %26 = tpu.matmul %24, %25, %cst_20 {dimension_numbers = #tpu.dot_dimension_numbers<[1], [0], [0], [1], [0, 0, 1, 1], [], []>} : vector<8x32xbf16>, vector<32x32xbf16>, vector<8x32xf32> -> vector<8x32xf32>
    %c0_21 = arith.constant 0 : index
    %c0_22 = arith.constant 0 : index
    %27 = vector.load %arg9[%c0_21, %c0_22] : memref<1x32xf32, #tpu.memory_space<vmem>>, vector<1x32xf32>
    %28 = vector.broadcast %27 : vector<1x32xf32> to vector<8x32xf32>
    %29 = arith.addf %26, %28 : vector<8x32xf32>
    %c0_23 = arith.constant 0 : index
    %c0_24 = arith.constant 0 : index
    %30 = vector.load %arg10[%c0_23, %c0_24] : memref<8x32xf32, #tpu.memory_space<vmem>>, vector<8x32xf32>
    tpu.vector_store %arg10[%c0_23, %c0_24], %29 {strides = array<i32>} : memref<8x32xf32, #tpu.memory_space<vmem>>, vector<8x32xf32>,
    return
  }
  func.func @transform_0(%arg0: i32) -> (i32, i32) {
    %c0_i32 = arith.constant 0 : i32
    %c0_i32_0 = arith.constant 0 : i32
    return %arg0, %c0_i32 : i32, i32
  }
  func.func @transform_1(%arg0: i32) -> (i32, i32) {
    %c0_i32 = arith.constant 0 : i32
    %c0_i32_0 = arith.constant 0 : i32
    %c0_i32_1 = arith.constant 0 : i32
    return %c0_i32, %c0_i32_0 : i32, i32
  }
  func.func @transform_2(%arg0: i32) -> (i32, i32) {
    %c0_i32 = arith.constant 0 : i32
    %c0_i32_0 = arith.constant 0 : i32
    %c0_i32_1 = arith.constant 0 : i32
    return %c0_i32, %c0_i32_0 : i32, i32
  }
  func.func @transform_3(%arg0: i32) -> (i32, i32) {
    %c0_i32 = arith.constant 0 : i32
    %c0_i32_0 = arith.constant 0 : i32
    %c0_i32_1 = arith.constant 0 : i32
    return %c0_i32, %c0_i32_0 : i32, i32
  }
  func.func @transform_4(%arg0: i32) -> (i32, i32) {
    %c0_i32 = arith.constant 0 : i32
    %c0_i32_0 = arith.constant 0 : i32
    %c0_i32_1 = arith.constant 0 : i32
    return %c0_i32, %c0_i32_0 : i32, i32
  }
  func.func @transform_5(%arg0: i32) -> (i32, i32) {
    %c0_i32 = arith.constant 0 : i32
    %c0_i32_0 = arith.constant 0 : i32
    %c0_i32_1 = arith.constant 0 : i32
    return %c0_i32, %c0_i32_0 : i32, i32
  }
  func.func @transform_6(%arg0: i32) -> (i32, i32) {
    %c0_i32 = arith.constant 0 : i32
    %c0_i32_0 = arith.constant 0 : i32
    %c0_i32_1 = arith.constant 0 : i32
    return %c0_i32, %c0_i32_0 : i32, i32
  }
  func.func @transform_7(%arg0: i32) -> (i32, i32) {
    %c0_i32 = arith.constant 0 : i32
    %c0_i32_0 = arith.constant 0 : i32
    %c0_i32_1 = arith.constant 0 : i32
    return %c0_i32, %c0_i32_0 : i32, i32
  }
  func.func @transform_8(%arg0: i32) -> (i32, i32) {
    %c0_i32 = arith.constant 0 : i32
    %c0_i32_0 = arith.constant 0 : i32
    %c0_i32_1 = arith.constant 0 : i32
    return %c0_i32, %c0_i32_0 : i32, i32
  }
  func.func @transform_9(%arg0: i32) -> (i32, i32) {
    %c0_i32 = arith.constant 0 : i32
    %c0_i32_0 = arith.constant 0 : i32
    return %arg0, %c0_i32 : i32, i32
  }
}

</mosaic_0001>

<bundles_post_ra>
// kernel: tpu_custom_call.1
= control target key start
LH: loop header
LB: loop body
LE: loop exit
PB: predicated region body
PF: predicated region fallthrough
CT: control target
= control target key end

     0   :  { %14 = vsyncpa [#allocation3], 0  ;;  %s667_s0 = inlined_call_operand.hbm [shape: bf16[8,8], index: 0, kind: input, shape index: {}]   ;;  %s668_s1 = inlined_call_operand.hbm [shape: bf16[8,64], index: 1, kind: input, shape index: {}]   ;;  %s669_s2 = inlined_call_operand.vmem [shape: f32[1,64], index: 2, kind: input, shape index: {}]   ;;  %s670_s3 = inlined_call_operand.vmem [shape: bf16[64,64], index: 3, kind: input, shape index: {}]   ;;  %s671_s4 = inlined_call_operand.vmem [shape: f32[1,64], index: 4, kind: input, shape index: {}]   ;;  %s672_s5 = inlined_call_operand.vmem [shape: bf16[64,32], index: 5, kind: input, shape index: {}]   ;;  %s673_s6 = inlined_call_operand.vmem [shape: f32[1,32], index: 6, kind: input, shape index: {}]   ;;  %s674_s7 = inlined_call_operand.vmem [shape: bf16[32,32], index: 7, kind: input, shape index: {}]   ;;  %s675_s8 = inlined_call_operand.vmem [shape: f32[1,32], index: 8, kind: input, shape index: {}]   ;;  %s676_s9 = inlined_call_operand.hbm [shape: f32[8,32], index: 9, kind: output, shape index: {}]  }
   0x1   :  { %15 = vsyncpa [#allocation6], 0 }
   0x2   :  { %16 = vsyncpa [#allocation4], 0  ;;  %s528_s30 = smov [#allocation2]   ;;  %s529_s11 = smov [#allocation5]  }
   0x3   :  { %s23_s10 = sshll.u32 %s528_s30, 4  ;;  %s33_s12 = sshll.u32 %s529_s11, 4  ;;  %s24_s10 = int_to_ptr.vmem [resolvable:$true] %s23_s10  ;;  %s34_s12 = int_to_ptr.vmem [resolvable:$true] %s33_s12 }
   0x4   :  { %s456_s15 = scalar_lea.hbm %s667_s0, 64 }
   0x5   :  { %p457_p0 = scmp.ne.s32.totalorder %s667_s0, %s456_s15  ;;  %p460_p1 = scmp.lt.u32.totalorder %s456_s15, %s667_s0 }
   0x7   :  { %p462_p2 = pnand %p460_p1, %p457_p0 }
   0x9   :  { %465 = shalt.err (!%p462_p2)
}
   0xa   :  { %s466_s20 = scalar_lea.vmem %s24_s10, 64  ;;  %p471_p4 = scmp.lt.s32.totalorder %s24_s10, %s24_s10 }
   0xb   :  { %p467_p3 = scmp.ne.s32.totalorder %s24_s10, %s466_s20  ;;  %p472_p5 = scmp.lt.s32.totalorder %s466_s20, %s466_s20 }
   0xd   :  { %p473_p6 = por %p472_p5, %p471_p4 }
   0xf   :  { %p474_p7 = pnand %p473_p6, %p467_p3 }
  0x11   :  { %477 = shalt.err (!%p474_p7)
}
  0x12   :  { %26 = dma.hbm_to_vmem [thread:$0]  %s667_s0, 64, %s24_s10, [#allocation3]  }
  0x13   :  { %s478_s25 = scalar_lea.hbm %s668_s1, 64 }
  0x14   :  { %p479_p8 = scmp.ne.s32.totalorder %s668_s1, %s478_s25  ;;  %p482_p9 = scmp.lt.u32.totalorder %s478_s25, %s668_s1 }
  0x16   :  { %p484_p10 = pnand %p482_p9, %p479_p8 }
  0x18   :  { %487 = shalt.err (!%p484_p10)
}
  0x19   :  { %s488_s30 = scalar_lea.vmem %s34_s12, 64  ;;  %p493_p12 = scmp.lt.s32.totalorder %s34_s12, %s34_s12 }
  0x1a   :  { %p489_p11 = scmp.ne.s32.totalorder %s34_s12, %s488_s30  ;;  %p494_p13 = scmp.lt.s32.totalorder %s488_s30, %s488_s30 }
  0x1c   :  { %p495_p0 = por %p494_p13, %p493_p12 }
  0x1e   :  { %p496_p1 = pnand %p495_p0, %p489_p11 }
  0x20   :  { %499 = shalt.err (!%p496_p1)
}
  0x21   :  { %36 = dma.hbm_to_vmem [thread:$0]  %s668_s1, 64, %s34_s12, [#allocation6]  }
  0x22   :  { %522 = dma.done.wait [#allocation3], 64  }
  0x23   :  { %523 = vsyncadd [#allocation3], 4294967232 }
  0x24   :  { %524 = dma.done.wait [#allocation6], 64  }
  0x25   :  { %525 = vsyncadd [#allocation6], 4294967232  ;;  %v530_v0 = vmov 0.0   ;;  %vm531_vm0 = vmmov 0   ;;  %vm71_vm1 = vcmask 1043456   ;;  %v446_v3 = vld [vmem:[%s670_s3] sm:$0xff]  }
  0x26   :  { %403 = vmatprep.subr.bf16.mxu0 %v530_v0  ;;  %405 = vmatprep.mubr.msk.bf16.mxu0 %vm531_vm0, %v530_v0  ;;  %v59_v1 = vld [vmem:[#allocation5] sm:$0xf]  ;;  %v58_v4 = vld [vmem:[#allocation2] sm:$0xf]  ;;  %vm67_vm2 = vcmask 64512   ;;  %v447_v5 = vld [vmem:[%s670_s3 + $0x8] sm:$0xff]  }
  0x27   :  { %409 = vmatprep.subr.bf16.mxu1 %v530_v0  ;;  %417 = vmatprep.mubr.msk.bf16.mxu1 %vm531_vm0, %v530_v0  ;;  %v73_v2 = vsel %vm71_vm1, %v59_v1, 0  ;;  %v448_v6 = vld [vmem:[%s670_s3 + $0x10] sm:$0xff]   ;;  %v449_v7 = vld [vmem:[%s670_s3 + $0x18] sm:$0xff]   ;;  %v450_v8 = vld [vmem:[%s672_s5] sm:$0xff]   ;;  %vm156_vm3 = vcmask 523264   ;;  %vm309_vm4 = vcmask 261120  }
  0x28   :  { %404 = vmatpush3.bf16.msra.mxu0 %v73_v2  ;;  %410 = vmatpush3.bf16.msra.mxu1 %v446_v3  ;;  %v451_v9 = vld [vmem:[%s672_s5 + $0x8] sm:$0xff]   ;;  %v370_v10 = vld [vmem:[%s669_s2] ss:$0 sm:$0xff]  ;;  %v452_v18 = vld [vmem:[%s672_s5 + $0x10] sm:$0xff]   ;;  %s532_s13 = smov [#allocation7]  }
  0x29   :  { %421 = vmatprep.subr.bf16.mxu0 %v530_v0  ;;  %411 = vmatprep.subr.bf16.mxu1 %v530_v0  ;;  %v453_v19 = vld [vmem:[%s672_s5 + $0x18] sm:$0xff]   ;;  %v454_v20 = vld [vmem:[%s674_s7] sm:$0xff]   ;;  %v455_v29 = vld [vmem:[%s674_s7 + $0x8] sm:$0xff]   ;;  %s360_s7 = sshll.u32 %s532_s13, 4  ;;  %s361_s7 = int_to_ptr.vmem [resolvable:$true] %s360_s7 }
  0x2a   :  { %v372_v21 = vld [vmem:[%s671_s4] ss:$0 sm:$0xff]  ;;  %p505_p3 = scmp.lt.s32.totalorder %s361_s7, %s361_s7 }
  0x2b   :  { %406 = vmatmul.mubr.msk.bf16.vlgmr.msra.gmra.mrb[0].mxu0 %vm67_vm2, %v58_v4  ;;  %v378_v30 = vld [vmem:[%s673_s6] ss:$0 sm:$0xff]  ;;  %s500_s6 = scalar_lea.vmem %s361_s7, 128 }
  0x2c   :  { %429 = vmatprep.mubr.msk.bf16.mxu0 %vm531_vm0, %v530_v0  ;;  %412 = vmatpush3.bf16.msra.mxu1 %v447_v5  ;;  %v384_v38 = vld [vmem:[%s675_s8] ss:$0 sm:$0xff]  ;;  %p501_p2 = scmp.ne.s32.totalorder %s361_s7, %s500_s6  ;;  %p506_p4 = scmp.lt.s32.totalorder %s500_s6, %s500_s6 }
  0x2d   :  { %413 = vmatprep.subr.bf16.mxu1 %v530_v0  ;;  %422 = vmatpush3.bf16.msra.mxu0 %v450_v8 }
  0x2e   :  { %423 = vmatprep.subr.bf16.mxu0 %v530_v0  ;;  %p507_p5 = por %p506_p4, %p505_p3 }
  0x30   :  { %414 = vmatpush3.bf16.msra.mxu1 %v448_v6  ;;  %p508_p6 = pnand %p507_p5, %p501_p2 }
  0x31   :  { %415 = vmatprep.subr.bf16.mxu1 %v530_v0  ;;  %424 = vmatpush3.bf16.msra.mxu0 %v451_v9 }
  0x32   :  { %425 = vmatprep.subr.bf16.mxu0 %v530_v0 }
  0x34   :  { %416 = vmatpush3.bf16.msra.mxu1 %v449_v7 }
  0x35   :  { %433 = vmatprep.subr.bf16.mxu1 %v530_v0  ;;  %426 = vmatpush3.bf16.msra.mxu0 %v452_v18 }
  0x36   :  { %427 = vmatprep.subr.bf16.mxu0 %v530_v0 }
  0x39   :  { %428 = vmatpush3.bf16.msra.mxu0 %v453_v19 }
  0xfe   :  { %v109_v11 = vpop.f32.mrb[0].mxu0 }
  0xff   :  { %v110_v12 = vadd.f32 %v370_v10, %v109_v11  ;;  %v407_v13 = vpop.f32.mrb[1].mxu0 }
 0x100   :  { %v112_v14 = vpop.f32.mrb[2].mxu0 }
 0x101   :  { %v115_v15 = vmax.f32 %v110_v12, 0.0  ;;  %v408_v16 = vpop.f32.mrb[3].mxu0 }
 0x103   :  { %v116_v17 = vpack.c.bf16 %v115_v15, %v115_v15 }
 0x105   :  { %418 = vmatmul.mubr.msk.bf16.vlgmr.msra.gmra.mrb[0].mxu1 %vm156_vm3, %v116_v17 }
 0x106   :  { %437 = vmatprep.mubr.msk.bf16.mxu1 %vm531_vm0, %v530_v0  ;;  %434 = vmatpush3.bf16.msra.mxu1 %v454_v20 }
 0x107   :  { %435 = vmatprep.subr.bf16.mxu1 %v530_v0 }
 0x10a   :  { %436 = vmatpush3.bf16.msra.mxu1 %v455_v29 }
 0x1d8   :  { %v194_v22 = vpop.f32.mrb[0].mxu1 }
 0x1d9   :  { %v195_v23 = vadd.f32 %v372_v21, %v194_v22  ;;  %v419_v24 = vpop.f32.mrb[1].mxu1 }
 0x1da   :  { %v197_v25 = vpop.f32.mrb[2].mxu1 }
 0x1db   :  { %v200_v26 = vmax.f32 %v195_v23, 0.0  ;;  %v420_v27 = vpop.f32.mrb[3].mxu1 }
 0x1dd   :  { %v201_v28 = vpack.c.bf16 %v200_v26, %v200_v26 }
 0x1df   :  { %430 = vmatmul.mubr.msk.bf16.vlgmr.msra.gmra.mrb[4].mxu0 %vm156_vm3, %v201_v28 }
 0x2b2   :  { %v278_v31 = vpop.f32.mrb[4].mxu0 }
 0x2b3   :  { %v279_v32 = vadd.f32 %v378_v30, %v278_v31  ;;  %v431_v33 = vpop.f32.mrb[5].mxu0 }
 0x2b4   :  { %v281_v34 = vpop.f32.mrb[6].mxu0 }
 0x2b5   :  { %v284_v35 = vmax.f32 %v279_v32, 0.0  ;;  %v432_v36 = vpop.f32.mrb[7].mxu0 }
 0x2b7   :  { %v285_v37 = vpack.c.bf16 %v284_v35, %v284_v35 }
 0x2b9   :  { %438 = vmatmul.mubr.msk.bf16.vlgmr.msra.gmra.mrb[4].mxu1 %vm309_vm4, %v285_v37 }
 0x38c   :  { %v347_v39 = vpop.f32.mrb[4].mxu1 }
 0x38d   :  { %v348_v40 = vadd.f32 %v384_v38, %v347_v39  ;;  %v439_v41 = vpop.f32.mrb[5].mxu1 }
 0x38e   :  { %v350_v42 = vpop.f32.mrb[6].mxu1 }
 0x38f   :  { %353 = vst.msk [vmem:[#allocation7] sm:$0xff] %vm309_vm4, %v348_v40  ;;  %v440_v43 = vpop.f32.mrb[7].mxu1 }
 0x390   :  { %511 = shalt.err (!%p508_p6)
}
 0x391   :  { %s512_s8 = scalar_lea.hbm %s676_s9, 128 }
 0x392   :  { %p513_p7 = scmp.ne.s32.totalorder %s676_s9, %s512_s8  ;;  %p516_p8 = scmp.lt.u32.totalorder %s512_s8, %s676_s9 }
 0x394   :  { %p518_p9 = pnand %p516_p8, %p513_p7 }
 0x396   :  { %521 = shalt.err (!%p518_p9)
}
 0x397   :  { %363 = dma.vmem_to_hbm [thread:$0]  %s361_s7, 128, %s676_s9, [#allocation4]  }
 0x398   :  { %526 = dma.done.wait [#allocation4], 128  }
 0x399   :  { %527 = vsyncadd [#allocation4], 4294967168 }
 0x39a   :  { %367 = vsyncpa [#allocation3], 1 }
 0x39b   :  { %368 = vsyncpa [#allocation6], 1 }
 0x39c   :  { %369 = vsyncpa [#allocation4], 1 }

</bundles_post_ra>
